<compile_context>
chip_gen: v6e
topology: v6e:2x2x1
jax: 0.10.0
libtpu: 0.0.40
codegen_flags: <defaults>
</compile_context>

<pallas_src>
import jax
import jax.numpy as jnp
from jax.experimental import pallas as pl
from jax.experimental.pallas import tpu as pltpu


def _vmem_capacity_bytes():
    """Generation-aware VMEM capacity (v5e/v6e: 128 MiB, v7x: 64 MiB)."""
    try:
        return int(pltpu.get_tpu_info().vmem_capacity_bytes)
    except Exception:
        return 64 << 20  # conservative fallback (v7x-sized)


def make_contrastive_loss(temperature=0.2, block_rows=None, block_cols=None,
                          operand_dtype=jnp.bfloat16):
    """Returns a callable (h1, h2) -> scalar loss matching the PyTorch module."""

    eps = 1e-12                      # F.normalize default eps (clamp_min on norm)
    inv_t = 1.0 / float(temperature)
    # Unit-norm rows => |logits| <= 1/T (a few rsqrt ULPs over is harmless), so
    # exp(logits) cannot overflow f32 for 1/T <= ~60: skip the running max AND
    # the constant shift entirely. For tiny temperatures keep the 1/T shift.
    use_bounded_lse = inv_t <= 60.0
    # TODO(synk): for temperatures < ~0.025 add a true online-max LSE; the
    # constant-shift fallback can underflow an entire row of exp().

    def normalize_kernel(h1_ref, h2_ref, h1s_ref, h2n_ref):
        h1 = h1_ref[...].astype(jnp.float32)
        h2 = h2_ref[...].astype(jnp.float32)
        inv_n1 = jax.lax.rsqrt(
            jnp.maximum(jnp.sum(h1 * h1, axis=1, keepdims=True), eps * eps))
        inv_n2 = jax.lax.rsqrt(
            jnp.maximum(jnp.sum(h2 * h2, axis=1, keepdims=True), eps * eps))
        # Fold 1/T into the h1 operand only; cast to the MXU operand dtype.
        h1s_ref[...] = (h1 * (inv_n1 * inv_t)).astype(h1s_ref.dtype)
        h2n_ref[...] = (h2 * inv_n2).astype(h2n_ref.dtype)

    def loss_kernel(a_row_ref, b_row_ref, a_col_ref, b_col_ref, out_ref,
                    la_ref, lb_ref):
        k = pl.program_id(1)

        @pl.when(k == 0)
        def _init():
            la_ref[...] = jnp.zeros_like(la_ref)
            lb_ref[...] = jnp.zeros_like(lb_ref)

        contract = (((1,), (1,)), ((), ()))     # contract feature dim; no .T copy
        # tile [i*tm:, k*tk:] of  logits   = h1s @ h2n^T   (1/T already folded)
        s_a = jax.lax.dot_general(a_row_ref[...], b_col_ref[...], contract,
                                  preferred_element_type=jnp.float32)
        # same tile of          logits^T  = h2n @ h1s^T
        s_b = jax.lax.dot_general(b_row_ref[...], a_col_ref[...], contract,
                                  preferred_element_type=jnp.float32)
        if use_bounded_lse:
            la_ref[...] += jnp.sum(jnp.exp(s_a), axis=1, keepdims=True)
            lb_ref[...] += jnp.sum(jnp.exp(s_b), axis=1, keepdims=True)
        else:
            la_ref[...] += jnp.sum(jnp.exp(s_a - inv_t), axis=1, keepdims=True)
            lb_ref[...] += jnp.sum(jnp.exp(s_b - inv_t), axis=1, keepdims=True)

        @pl.when(k == pl.num_programs(1) - 1)
        def _finalize():
            a = a_row_ref[...].astype(jnp.float32)
            b = b_row_ref[...].astype(jnp.float32)
            # Shared diagonal: logits[r, r] = <h1s[r], h2n[r]>.
            diag = jnp.sum(a * b, axis=1, keepdims=True)
            shift = 0.0 if use_bounded_lse else inv_t
            lse_a = shift + jnp.log(la_ref[...])
            lse_b = shift + jnp.log(lb_ref[...])
            out_ref[...] = lse_a + lse_b - 2.0 * diag

    def fn(h1, h2):
        assert h1.ndim == 2 and h1.shape == h2.shape
        n, c = h1.shape
        op_bytes = jnp.dtype(operand_dtype).itemsize
        in_bytes = jnp.dtype(h1.dtype).itemsize

        vmem_cap = _vmem_capacity_bytes()
        budget = (vmem_cap * 3) // 4            # headroom for Mosaic internals

        # Row tile: big (fewer grid steps, fewer column-stream re-reads);
        # 512 on 128-MiB chips, 256 on v7x.
        tm = block_rows if block_rows is not None else (
            512 if vmem_cap >= (96 << 20) else 256)
        tm = min(tm, n)
        assert n % tm == 0, "batch size must be divisible by the row-block size"

        def pass2_vmem(tm_, tk_):
            operands = 4 * (tm_ + tk_) * c * op_bytes   # 2 arrays, double-buffered
            logits = 6 * tm_ * tk_ * 4                  # s_a/s_b/exp temporaries
            misc = 16 * tm_ + (2 << 20)                 # accumulators/out + slack
            return operands + logits + misc

        # Column tile: keep the full column dim resident (no HBM re-reads) when
        # it fits the budget; otherwise stream column blocks (flash-style
        # fallback that works for any N*C, incl. v7x's 64 MiB VMEM).
        if block_cols is not None:
            tk = min(block_cols, n)
        else:
            tk = n if pass2_vmem(tm, n) <= budget else tm
        assert n % tk == 0, "batch size must be divisible by the col-block size"
        n_row_blocks, n_col_blocks = n // tm, n // tk

        def pass1_vmem(t):
            return (4 * t * c * in_bytes + 4 * t * c * op_bytes
                    + 4 * t * c * 4 + (2 << 20))

        tn = tm
        while tn > 8 and pass1_vmem(tn) > budget:
            tn //= 2
        assert n % tn == 0

        p1_limit = int(min(max(2 * pass1_vmem(tn), 32 << 20), budget))
        p2_limit = int(min(max(2 * pass2_vmem(tm, tk), 32 << 20), budget))

        # Pass 1: normalize once, emit bf16 operands (1/T folded into h1s).
        h1s, h2n = pl.pallas_call(
            normalize_kernel,
            out_shape=(jax.ShapeDtypeStruct((n, c), operand_dtype),
                       jax.ShapeDtypeStruct((n, c), operand_dtype)),
            grid_spec=pltpu.PrefetchScalarGridSpec(
                num_scalar_prefetch=0,
                grid=(n // tn,),
                in_specs=[pl.BlockSpec((tn, c), lambda i: (i, 0)),
                          pl.BlockSpec((tn, c), lambda i: (i, 0))],
                out_specs=[pl.BlockSpec((tn, c), lambda i: (i, 0)),
                           pl.BlockSpec((tn, c), lambda i: (i, 0))],
            ),
            compiler_params=pltpu.CompilerParams(
                dimension_semantics=("parallel",),
                vmem_limit_bytes=p1_limit,
            ),
        )(h1, h2)

        # Pass 2: per-row (lse + lse_T - 2*diag); row blocks parallel (both v7x
        # TensorCores), column blocks streamed with online LSE accumulation.
        per_row = pl.pallas_call(
            loss_kernel,
            out_shape=jax.ShapeDtypeStruct((n, 1), jnp.float32),
            grid_spec=pltpu.PrefetchScalarGridSpec(
                num_scalar_prefetch=0,
                grid=(n_row_blocks, n_col_blocks),
                in_specs=[
                    pl.BlockSpec((tm, c), lambda i, k: (i, 0)),   # h1s row tile
                    pl.BlockSpec((tm, c), lambda i, k: (i, 0)),   # h2n row tile
                    pl.BlockSpec((tk, c), lambda i, k: (k, 0)),   # h1s col tile
                    pl.BlockSpec((tk, c), lambda i, k: (k, 0)),   # h2n col tile
                ],
                out_specs=pl.BlockSpec((tm, 1), lambda i, k: (i, 0)),
                scratch_shapes=[pltpu.VMEM((tm, 1), jnp.float32),
                                pltpu.VMEM((tm, 1), jnp.float32)],
            ),
            compiler_params=pltpu.CompilerParams(
                dimension_semantics=("parallel", "arbitrary"),
                vmem_limit_bytes=p2_limit,
            ),
        )(h1s, h2n, h1s, h2n)

        # Final reduction in the wrapper: removes accumulator drift and is what
        # lets the row axis be truly parallel across TensorCores.
        return jnp.sum(per_row) / (2.0 * n)

    return fn


def contrastive_loss_reference(h1, h2, temperature=0.2, eps=1e-12):
    """Pure-JAX f32 reference mirroring the PyTorch module."""
    def normalize(x):
        nrm = jnp.sqrt(jnp.sum(x * x, axis=1, keepdims=True))
        return x / jnp.maximum(nrm, eps)

    def loss(a, b):
        logits = (a @ b.T) / temperature
        n = logits.shape[0]
        lse = jax.scipy.special.logsumexp(logits, axis=1)
        diag = logits[jnp.arange(n), jnp.arange(n)]
        return jnp.mean(lse - diag)

    h1n, h2n = normalize(h1), normalize(h2)
    return (loss(h1n, h2n) + loss(h2n, h1n)) / 2


if __name__ == "__main__":
    key = jax.random.PRNGKey(0)
    k1, k2 = jax.random.split(key)
    N, C = 32, 64  # small: batch=32 embeddings of hidden=64
    h1 = jax.random.normal(k1, (N, C), dtype=jnp.float32)
    h2 = jax.random.normal(k2, (N, C), dtype=jnp.float32)

    # Small blocks so the demo exercises the parallel row axis (2 blocks), the
    # streamed column axis (online-LSE init/accumulate/finalize over 2 blocks)
    # and the two-pass normalize->loss pipeline.
    loss_fn = make_contrastive_loss(temperature=0.2, block_rows=16, block_cols=16)
    loss = jax.block_until_ready(loss_fn(h1, h2))

    ref = jax.block_until_ready(contrastive_loss_reference(h1, h2, 0.2))
    # bf16 MXU operands (per the perf review) trade a few 1e-4 of absolute
    # accuracy for half the operand footprint and native MXU rate.
    assert jnp.allclose(loss, ref, atol=3e-3, rtol=3e-3), (loss, ref)

    print("KERNEL_OK")
</pallas_src>

<mosaic_0001>
module attributes {stable_mosaic.version = 11 : i64} {
  func.func @normalize_kernel(%arg0: i32, %arg1: memref<16x64xf32, #tpu.memory_space<vmem>>, %arg2: memref<16x64xf32, #tpu.memory_space<vmem>>, %arg3: memref<16x64xbf16, #tpu.memory_space<vmem>>, %arg4: memref<16x64xbf16, #tpu.memory_space<vmem>>) attributes {dimension_semantics = [#tpu.dimension_semantics<parallel>], iteration_bounds = array<i64: 2>, scalar_prefetch = 0 : i64, scratch_operands = 0 : i64, tpu.core_type = #tpu.core_type<tc>, window_params = [{transform_indices = @transform_0, window_bounds = array<i64: 16, 64>}, {transform_indices = @transform_1, window_bounds = array<i64: 16, 64>}, {transform_indices = @transform_2, window_bounds = array<i64: 16, 64>}, {transform_indices = @transform_3, window_bounds = array<i64: 16, 64>}]} {
    %c0 = arith.constant 0 : index
    %c0_0 = arith.constant 0 : index
    %0 = vector.load %arg1[%c0, %c0_0] : memref<16x64xf32, #tpu.memory_space<vmem>>, vector<16x64xf32>
    %c0_1 = arith.constant 0 : index
    %c0_2 = arith.constant 0 : index
    %1 = vector.load %arg2[%c0_1, %c0_2] : memref<16x64xf32, #tpu.memory_space<vmem>>, vector<16x64xf32>
    %2 = arith.mulf %0, %0 : vector<16x64xf32>
    %cst = arith.constant dense<0.000000e+00> : vector<16xf32>
    %3 = vector.multi_reduction <add>, %2, %cst [1] : vector<16x64xf32> to vector<16xf32>
    %4 = vector.shape_cast %3 : vector<16xf32> to vector<16x1xf32>
    %cst_3 = arith.constant 1.000000e-24 : f32
    %5 = vector.broadcast %cst_3 : f32 to vector<16x1xf32>
    %6 = arith.maximumf %4, %5 : vector<16x1xf32>
    %7 = math.rsqrt %6 : vector<16x1xf32>
    %8 = arith.mulf %1, %1 : vector<16x64xf32>
    %cst_4 = arith.constant dense<0.000000e+00> : vector<16xf32>
    %9 = vector.multi_reduction <add>, %8, %cst_4 [1] : vector<16x64xf32> to vector<16xf32>
    %10 = vector.shape_cast %9 : vector<16xf32> to vector<16x1xf32>
    %cst_5 = arith.constant 1.000000e-24 : f32
    %11 = vector.broadcast %cst_5 : f32 to vector<16x1xf32>
    %12 = arith.maximumf %10, %11 : vector<16x1xf32>
    %13 = math.rsqrt %12 : vector<16x1xf32>
    %cst_6 = arith.constant 5.000000e+00 : f32
    %14 = vector.broadcast %cst_6 : f32 to vector<16x1xf32>
    %15 = arith.mulf %7, %14 : vector<16x1xf32>
    %16 = vector.broadcast %15 : vector<16x1xf32> to vector<16x64xf32>
    %17 = arith.mulf %0, %16 : vector<16x64xf32>
    %18 = arith.truncf %17 : vector<16x64xf32> to vector<16x64xbf16>
    %c0_7 = arith.constant 0 : index
    %c0_8 = arith.constant 0 : index
    %19 = vector.load %arg3[%c0_7, %c0_8] : memref<16x64xbf16, #tpu.memory_space<vmem>>, vector<16x64xbf16>
    tpu.vector_store %arg3[%c0_7, %c0_8], %18 {strides = array<i32>} : memref<16x64xbf16, #tpu.memory_space<vmem>>, vector<16x64xbf16>,
    %20 = vector.broadcast %13 : vector<16x1xf32> to vector<16x64xf32>
    %21 = arith.mulf %1, %20 : vector<16x64xf32>
    %22 = arith.truncf %21 : vector<16x64xf32> to vector<16x64xbf16>
    %c0_9 = arith.constant 0 : index
    %c0_10 = arith.constant 0 : index
    %23 = vector.load %arg4[%c0_9, %c0_10] : memref<16x64xbf16, #tpu.memory_space<vmem>>, vector<16x64xbf16>
    tpu.vector_store %arg4[%c0_9, %c0_10], %22 {strides = array<i32>} : memref<16x64xbf16, #tpu.memory_space<vmem>>, vector<16x64xbf16>,
    return
  }
  func.func @transform_0(%arg0: i32) -> (i32, i32) {
    %c0_i32 = arith.constant 0 : i32
    %c0_i32_0 = arith.constant 0 : i32
    return %arg0, %c0_i32 : i32, i32
  }
  func.func @transform_1(%arg0: i32) -> (i32, i32) {
    %c0_i32 = arith.constant 0 : i32
    %c0_i32_0 = arith.constant 0 : i32
    return %arg0, %c0_i32 : i32, i32
  }
  func.func @transform_2(%arg0: i32) -> (i32, i32) {
    %c0_i32 = arith.constant 0 : i32
    %c0_i32_0 = arith.constant 0 : i32
    return %arg0, %c0_i32 : i32, i32
  }
  func.func @transform_3(%arg0: i32) -> (i32, i32) {
    %c0_i32 = arith.constant 0 : i32
    %c0_i32_0 = arith.constant 0 : i32
    return %arg0, %c0_i32 : i32, i32
  }
}

</mosaic_0001>

<bundles_post_ra>
// kernel: tpu_custom_call.1
= control target key start
LH: loop header
LB: loop body
LE: loop exit
PB: predicated region body
PF: predicated region fallthrough
CT: control target
= control target key end

     0   :  { %9 = vsyncpa [#allocation3], 0  ;;  %s1006_s0 = inlined_call_operand.hbm [shape: f32[32,64], index: 0, kind: input, shape index: {}]   ;;  %s1007_s1 = inlined_call_operand.hbm [shape: f32[32,64], index: 1, kind: input, shape index: {}]   ;;  %s1008_s2 = inlined_call_operand.hbm [shape: bf16[32,64], index: 2, kind: output, shape index: {0}]   ;;  %s1009_s3 = inlined_call_operand.hbm [shape: bf16[32,64], index: 3, kind: output, shape index: {1}]  }
   0x1   :  { %11 = vsyncpa [#allocation3 + $0x1], 0 }
   0x2   :  { %12 = vsyncpa [#allocation6], 0 }
   0x3   :  { %14 = vsyncpa [#allocation6 + $0x1], 0 }
   0x4   :  { %15 = vsyncpa [#allocation4], 0 }
   0x5   :  { %17 = vsyncpa [#allocation4 + $0x1], 0 }
   0x6   :  { %18 = vsyncpa [#allocation9], 0 }
   0x7   :  { %20 = vsyncpa [#allocation9 + $0x1], 0  ;;  %s749_s12 = smov 0   ;;  %s751_s13 = smov 0  }
   0x8   :  { %s753_s14 = smov 0   ;;  %s755_s15 = smov 0  }
   0x9 LB: > { %s770_s16 = sadd.s32 4294967295, %s719_s15   ;;  %s463_s17 = sadd.s32 4294967294, %s719_s15   ;;  %s719_s15 = sphi %s755_s15, %s1025_s15   ;;  %s715_s14 = sphi %s753_s14, %s1024_s14   ;;  %s711_s13 = sphi %s751_s13, %s1023_s13   ;;  %s707_s12 = sphi %s749_s12, %s1022_s12  }
   0xa   : > { %s774_s18 = sadd.s32 1, %s719_s15   ;;  %s33_s19 = sadd.s32 1, %s715_s14 }
   0xb   : > { %s30_s20 = ssub.s32 %s719_s15, %s774_s18  ;;  %p40_p0 = scmp.ne.s32.totalorder %s715_s14, %s711_s13 }
   0xc   : > { %p31_p1 = scmp.eq.s32.totalorder %s30_s20, 0  ;;  %p41_p2 = scmp.eq.s32.totalorder %s719_s15, 0 }
   0xd   : > { %p46_p3 = scmp.ne.s32.totalorder %s711_s13, %s707_s12  ;;  %p47_p4 = scmp.eq.s32.totalorder %s770_s16, 0 }
   0xe   : > { %s786_s21 = scalar_select %p31_p1, %s715_s14, %s33_s19  }
   0xf   : > { %p788_p5 = por %p41_p2, %p40_p0  ;;  %p792_p6 = por %p47_p4, %p46_p3 }
  0x10   : > { %p96_p7 = scmp.eq.s32.totalorder %s770_s16, 1  ;;  %p102_p8 = scmp.eq.s32.totalorder %s463_s17, 1 }
  0x11   : > { %s1013_s23 = scalar_select %p792_p6, 1, 0 }
  0x12   : > { %p519_p10 = scmp.lt.s32.totalorder %s719_s15, 2  ;;  %p799_p11 = por %p96_p7, %p40_p0 }
  0x13   : > { %p803_p12 = por %p102_p8, %p46_p3  ;;  %s808_s26 = sand.u32 1, %s715_s14  }
  0x14   : > { %s1014_s24 = scalar_select %p799_p11, 1, 0 }
  0x15   : > { %s1015_s25 = scalar_select %p803_p12, 1, 0 }
  0x16   : > { %s489_s27 = sshll.u32 %s719_s15, 8  ;;  %s466_s28 = sshll.u32 %s808_s26, 4 }
  0x17   : > { %s817_s4 = scalar_lea.hbm %s1006_s0, %s489_s27  ;;  %s152_s5 = scalar_lea.vmem [#allocation2], %s466_s28 }
  0x18   : > { %s159_s6 = sshll.u32 %s152_s5, 4  ;;  %p823_p13 = pnand %p519_p10, %p788_p5  ;;  %s827_s6 = int_to_ptr.vmem [resolvable:$true] %s159_s6 }
  0x19   : > { %s149_s8 = scalar_lea.sflag [#allocation3], %s808_s26  ;;  %s565_s9 = scalar_lea.hbm %s817_s4, 256 }
  0x1a   : > { %p566_p0 = scmp.ne.s32.totalorder %s817_s4, %s565_s9  ;;  %p567_p1 = pneg %p823_p13 }
  0x1b   : > { %s570_s17 = scalar_lea.hbm %s1006_s0, 512  ;;  %p571_p4 = scmp.lt.s32.totalorder %s817_s4, %s1006_s0 }
  0x1c   : > { %p568_p2 = pnand %p567_p1, %p566_p0  ;;  %p572_p5 = scmp.lt.s32.totalorder %s570_s17, %s565_s9 }
  0x1e   : > { %p569_p3 = pneg %p568_p2  ;;  %p573_p7 = por %p572_p5, %p571_p4 }
  0x20   : > { %p574_p8 = pnand %p573_p7, %p569_p3 }
  0x22   : > { %577 = shalt.err (!%p574_p8)
}
  0x23   : > { %s578_s22 = scalar_lea.vmem %s827_s6, 256  ;;  %s721_s29 = smov [#allocation2]  }
  0x24   : > { %p579_p10 = scmp.ne.s32.totalorder %s827_s6, %s578_s22  ;;  %s583_s30 = sshll.u32 %s721_s29, 4  ;;  %s584_s30 = int_to_ptr.vmem [resolvable:$false] %s583_s30 }
  0x25   : > { %s585_s5 = scalar_lea.vmem %s584_s30, 512  ;;  %p586_p9 = scmp.lt.s32.totalorder %s827_s6, %s584_s30 }
  0x26   : > { %p581_p0 = pnand %p579_p10, %p567_p1  ;;  %p587_p12 = scmp.lt.s32.totalorder %s585_s5, %s578_s22 }
  0x28   : > { %p582_p2 = pneg %p581_p0  ;;  %p588_p11 = por %p587_p12, %p586_p9 }
  0x2a   : > { %p589_p4 = pnand %p588_p11, %p582_p2 }
  0x2c   : > { %592 = shalt.err (!%p589_p4)
}
  0x2d   : > { %s722_s9 = smov 128   ;;  %s723_s10 = smov 8  }
  0x2e   : > { %508 = dma.hbm_to_vmem [thread:$0]  (!%p823_p13), %s817_s4, 256, %s827_s6, %s149_s8, %s722_s9, %s722_s9, %s723_s10  }
  0x2f   : > { %p472_p9 = scmp.ge.s32.totalorder %s719_s15, 1  ;;  %p188_p11 = scmp.lt.s32.totalorder %s719_s15, 3 }
  0x30   : > { %s870_s20 = scalar_lea.hbm %s1007_s1, %s489_s27  ;;  %s173_s22 = scalar_lea.vmem [#allocation5], %s466_s28 }
  0x31   : > { %p861_p12 = pnand %p472_p9, %p188_p11  ;;  %s180_s29 = sshll.u32 %s173_s22, 4  ;;  %s874_s29 = int_to_ptr.vmem [resolvable:$true] %s180_s29 }
  0x32   : > { %s170_s4 = scalar_lea.sflag [#allocation6], %s808_s26  ;;  %s593_s6 = scalar_lea.hbm %s870_s20, 256 }
  0x33   : > { %p594_p3 = scmp.ne.s32.totalorder %s870_s20, %s593_s6  ;;  %s598_s27 = scalar_lea.hbm %s1007_s1, 512 }
  0x34   : > { %p599_p8 = scmp.lt.s32.totalorder %s870_s20, %s1007_s1  ;;  %p600_p10 = scmp.lt.s32.totalorder %s598_s27, %s593_s6 }
  0x35   : > { %p596_p5 = pnand %p594_p3, %p567_p1 }
  0x36   : > { %p601_p0 = por %p600_p10, %p599_p8 }
  0x37   : > { %p597_p7 = pneg %p596_p5 }
  0x39   : > { %p602_p2 = pnand %p601_p0, %p597_p7 }
  0x3b   : > { %605 = shalt.err (!%p602_p2)
}
  0x3c   : > { %s606_s26 = scalar_lea.vmem %s874_s29, 256  ;;  %s724_s28 = smov [#allocation5]  }
  0x3d   : > { %p607_p4 = scmp.ne.s32.totalorder %s874_s29, %s606_s26  ;;  %s611_s19 = sshll.u32 %s724_s28, 4  ;;  %s612_s19 = int_to_ptr.vmem [resolvable:$false] %s611_s19 }
  0x3e   : > { %s613_s22 = scalar_lea.vmem %s612_s19, 512  ;;  %p614_p3 = scmp.lt.s32.totalorder %s874_s29, %s612_s19 }
  0x3f   : > { %p609_p9 = pnand %p607_p4, %p567_p1  ;;  %p615_p5 = scmp.lt.s32.totalorder %s613_s22, %s606_s26 }
  0x41   : > { %p610_p11 = pneg %p609_p9  ;;  %p616_p6 = por %p615_p5, %p614_p3 }
  0x43   : > { %p617_p8 = pnand %p616_p6, %p610_p11 }
  0x45   : > { %620 = shalt.err (!%p617_p8)
}
  0x46   : > { %511 = dma.hbm_to_vmem [thread:$0]  (!%p823_p13), %s870_s20, 256, %s874_s29, %s170_s4, %s722_s9, %s722_s9, %s723_s10  }
  0x47   : > { %192 = sbr.rel (%p861_p12) target bundleno = 283 (0x11b), region = 28  ;;  %s905_s6 = sand.u32 (!%p861_p12), 1, %s711_s13  }
  0x48   : > { %s473_s8 = sshll.u32 (!%p861_p12), %s905_s6, 4  ;;  %s195_s30 = scalar_lea.sflag (!%p861_p12), [#allocation3], %s905_s6 }
  0x49   : > { %s198_s27 = scalar_lea.vmem (!%p861_p12), [#allocation2], %s473_s8  ;;  %p1018_p6 = scmp.ne.s32.totalorder (!%p861_p12), %s1013_s23, 0 }
  0x4c   : > { %690 = dma.done.wait (%p1018_p6), %s195_s30, 256  }
  0x4d   : > { %692 = vsyncadd (%p1018_p6), %s195_s30, 4294967040  ;;  %s204_s7 = scalar_lea.sflag [#allocation6], %s905_s6  ;;  %s207_s9 = scalar_lea.vmem [#allocation5], %s473_s8 }
  0x4e   : > { %694 = dma.done.wait (%p1018_p6), %s204_s7, 256  }
  0x4f   : > { %696 = vsyncadd (%p1018_p6), %s204_s7, 4294967040  ;;  %v244_v0 = vld [vmem:[%s198_s27] sm:$0xff]  ;;  %vm250_vm0 = vcmask 523264   ;;  %v245_v2 = vld [vmem:[%s198_s27 + $0x8] sm:$0xff]  ;;  %s475_s23 = sshll.u32 %s905_s6, 3  ;;  %vm285_vm1 = vcmask 519168  }
  0x50   : > { %v246_v1 = vld [vmem:[%s207_s9] sm:$0xff]  ;;  %v248_v3 = vmul.f32 %v244_v0, %v244_v0  ;;  %v249_v5 = vmul.f32 %v245_v2, %v245_v2  ;;  %v247_v6 = vld [vmem:[%s207_s9 + $0x8] sm:$0xff]  ;;  %s495_s10 = sshll.u32 %s770_s16, 7  ;;  %s232_s11 = scalar_lea.vmem [#allocation7], %s475_s23 }
  0x51   : > { %v261_v4 = vmul.f32 %v246_v1, %v246_v1  ;;  %v262_v7 = vmul.f32 %v247_v6, %v247_v6  ;;  %s319_s20 = sshll.u32 %s232_s11, 4  ;;  %s239_s29 = scalar_lea.vmem [#allocation8], %s475_s23  ;;  %s934_s20 = int_to_ptr.vmem [resolvable:$true] %s319_s20 }
  0x52   : > { %v251_v8 = vsel %vm250_vm0, %v248_v3, 0.0  ;;  %v254_v10 = vsel %vm250_vm0, %v249_v5, 0.0  ;;  %s335_s4 = sshll.u32 %s239_s29, 4  ;;  %s925_s16 = scalar_lea.hbm %s1009_s3, %s495_s10  ;;  %s927_s4 = int_to_ptr.vmem [resolvable:$true] %s335_s4 }
  0x53   : > { %v263_v9 = vsel %vm250_vm0, %v261_v4, 0.0  ;;  %252 = vadd.xlane.f32.xlu0 %v251_v8  ;;  %v266_v11 = vsel %vm250_vm0, %v262_v7, 0.0  ;;  %s932_s19 = scalar_lea.hbm %s1008_s2, %s495_s10  ;;  %s306_s22 = scalar_lea.sflag [#allocation9], %s905_s6 }
  0x54   : > { %264 = vadd.xlane.f32.xlu1 %v263_v9  ;;  %s621_s8 = scalar_lea.vmem %s927_s4, 128  ;;  %p1019_p1 = scmp.ne.s32.totalorder %s1014_s24, 0 }
  0x55   : > { %p622_p13 = scmp.ne.s32.totalorder %s927_s4, %s621_s8  ;;  %s725_s30 = smov [#allocation8]  }
  0x56   : > { %s625_s27 = sshll.u32 %s725_s30, 4  ;;  %s626_s27 = int_to_ptr.vmem [resolvable:$false] %s625_s27 }
  0x57   : > { %255 = vadd.xlane.f32.xlu0 %v254_v10  ;;  %p623_p12 = pnand %p622_p13, %p1019_p1  ;;  %s627_s7 = scalar_lea.vmem %s626_s27, 256 }
  0x58   : > { %267 = vadd.xlane.f32.xlu1 %v266_v11  ;;  %p628_p10 = scmp.lt.s32.totalorder %s927_s4, %s626_s27  ;;  %p629_p0 = scmp.lt.s32.totalorder %s627_s7, %s621_s8 }
  0x59   : > { %p624_p7 = pneg %p623_p12 }
  0x5a   : > { %p630_p2 = por %p629_p0, %p628_p10 }
  0x5c   : > { %p631_p4 = pnand %p630_p2, %p624_p7 }
  0xdc   : > { %v253_v12 = vpop.xlane.xlu0 %252 }
  0xdd   : > { %v265_v13 = vpop.xlane.xlu1 %264  ;;  %v257_v14 = vmax.f32 %v253_v12, 1e-24 }
  0xde   : > { %v269_v15 = vmax.f32 %v265_v13, 1e-24 }
  0xdf   : > { %557 = vrsqrt.f32 %v257_v14 }
  0xe0   : > { %559 = vrsqrt.f32 %v269_v15  ;;  %v256_v16 = vpop.xlane.xlu0 %255 }
  0xe1   : > { %v268_v17 = vpop.xlane.xlu1 %267  ;;  %v258_v18 = vmax.f32 %v256_v16, 1e-24 }
  0xe2   : > { %v270_v19 = vmax.f32 %v268_v17, 1e-24 }
  0xe3   : > { %561 = vrsqrt.f32 %v258_v18 }
  0xe4   : > { %563 = vrsqrt.f32 %v270_v19 }
  0xec   : > { %v558_v20 = vpop.eup %557 }
  0xed   : > { %v560_v21 = vpop.eup %559  ;;  %v273_v22 = vmul.f32 5.0, %v558_v20 }
  0xee   : > { %v288_v23 = vmul.f32 %v560_v21, %v246_v1 }
  0xef   : > { %v275_v24 = vmul.f32 %v273_v22, %v244_v0 }
  0xf0   : > { %v562_v25 = vpop.eup %561  ;;  %v493_v26 = vpack.c.bf16 %v288_v23, %v288_v23 }
  0xf1   : > { %v564_v27 = vpop.eup %563  ;;  %v491_v28 = vpack.c.bf16 %v275_v24, %v275_v24  ;;  %v274_v29 = vmul.f32 5.0, %v562_v25 }
  0xf2   : > { %v289_v30 = vmul.f32 %v564_v27, %v247_v6  ;;  %298 = vst.msk [vmem:[%s239_s29] sm:$0xf] %vm285_vm1, %v493_v26 }
  0xf3   : > { %286 = vst.msk [vmem:[%s232_s11] sm:$0xf] %vm285_vm1, %v491_v28  ;;  %v276_v31 = vmul.f32 %v274_v29, %v245_v2 }
  0xf4   : > { %v494_v32 = vpack.c.bf16 %v289_v30, %v289_v30 }
  0xf5   : > { %v492_v33 = vpack.c.bf16 %v276_v31, %v276_v31 }
  0xf6   : > { %299 = vst.msk [vmem:[%s239_s29 + $0x4] sm:$0xf] %vm285_vm1, %v494_v32 }
  0xf7   : > { %287 = vst.msk [vmem:[%s232_s11 + $0x4] sm:$0xf] %vm285_vm1, %v492_v33 }
  0xf8   : > { %634 = shalt.err (!%p631_p4)
}
  0xf9   : > { %s635_s9 = scalar_lea.hbm %s925_s16, 128  ;;  %s639_s11 = scalar_lea.hbm %s1009_s3, 256 }
  0xfa   : > { %p636_p9 = scmp.ne.s32.totalorder %s925_s16, %s635_s9  ;;  %p640_p5 = scmp.lt.s32.totalorder %s925_s16, %s1009_s3 }
  0xfb   : > { %p641_p8 = scmp.lt.s32.totalorder %s639_s11, %s635_s9 }
  0xfc   : > { %p637_p11 = pnand %p636_p9, %p1019_p1 }
  0xfd   : > { %p642_p6 = por %p641_p8, %p640_p5 }
  0xfe   : > { %p638_p3 = pneg %p637_p11 }
 0x100   : > { %p643_p13 = pnand %p642_p6, %p638_p3 }
 0x102   : > { %646 = shalt.err (!%p643_p13)
}
 0x103   : > { %s726_s17 = smov 64   ;;  %s727_s26 = smov 4  }
 0x104   : > { %502 = dma.vmem_to_hbm [thread:$0]  (%p1019_p1), %s927_s4, 128, %s925_s16, %s306_s22, %s726_s17, %s726_s17, %s727_s26  }
 0x105   : > { %s301_s28 = scalar_lea.sflag [#allocation4], %s905_s6  ;;  %s647_s8 = scalar_lea.vmem %s934_s20, 128 }
 0x106   : > { %p648_p12 = scmp.ne.s32.totalorder %s934_s20, %s647_s8  ;;  %s728_s30 = smov [#allocation7]  }
 0x107   : > { %s651_s27 = sshll.u32 %s728_s30, 4  ;;  %s652_s27 = int_to_ptr.vmem [resolvable:$false] %s651_s27 }
 0x108   : > { %p649_p7 = pnand %p648_p12, %p1019_p1  ;;  %s653_s7 = scalar_lea.vmem %s652_s27, 256 }
 0x109   : > { %p654_p0 = scmp.lt.s32.totalorder %s934_s20, %s652_s27  ;;  %p655_p2 = scmp.lt.s32.totalorder %s653_s7, %s647_s8 }
 0x10a   : > { %p650_p10 = pneg %p649_p7 }
 0x10b   : > { %p656_p4 = por %p655_p2, %p654_p0 }
 0x10d   : > { %p657_p9 = pnand %p656_p4, %p650_p10 }
 0x10f   : > { %660 = shalt.err (!%p657_p9)
}
 0x110   : > { %s661_s4 = scalar_lea.hbm %s932_s19, 128  ;;  %s665_s22 = scalar_lea.hbm %s1008_s2, 256 }
 0x111   : > { %p662_p11 = scmp.ne.s32.totalorder %s932_s19, %s661_s4  ;;  %p666_p8 = scmp.lt.s32.totalorder %s932_s19, %s1008_s2 }
 0x112   : > { %p667_p6 = scmp.lt.s32.totalorder %s665_s22, %s661_s4 }
 0x113   : > { %p663_p3 = pnand %p662_p11, %p1019_p1 }
 0x114   : > { %p668_p13 = por %p667_p6, %p666_p8 }
 0x115   : > { %p664_p5 = pneg %p663_p3 }
 0x117   : > { %p669_p12 = pnand %p668_p13, %p664_p5 }
 0x119   : > { %672 = shalt.err (!%p669_p12)
}
 0x11a   : > { %501 = dma.vmem_to_hbm [thread:$0]  (%p1019_p1), %s934_s20, 128, %s932_s19, %s301_s28, %s726_s17, %s726_s17, %s727_s26  }
 0x11b PF: > { %s350_s10 = sand.u32 1, %s707_s12   ;;  %p1020_p7 = scmp.ne.s32.totalorder %s1015_s25, 0 }
 0x11c   : > { %p1021_p10 = scmp.ge.s32.totalorder %s719_s15, 2  ;;  %s351_s11 = scalar_lea.sflag [#allocation4], %s350_s10 }
 0x11e   : > { %p513_p0 = pnand %p1021_p10, %p1020_p7 }
 0x120   : > { %p514_p2 = pneg %p513_p0 }
 0x122   : > { %698 = dma.done.wait (%p514_p2), %s351_s11, 128  }
 0x123   : > { %700 = vsyncadd (%p514_p2), %s351_s11, 4294967168  ;;  %s360_s29 = scalar_lea.sflag [#allocation9], %s350_s10 }
 0x124   : > { %702 = dma.done.wait (%p514_p2), %s360_s29, 128  }
 0x125   : > { %704 = vsyncadd (%p514_p2), %s360_s29, 4294967168  ;;  %p23_p1 = scmp.ge.s32.totalorder %s774_s18, 4   ;;  %s1022_s12 = smov %s711_s13 }
 0x126   : > { %s1023_s13 = smov %s715_s14  ;;  %s1024_s14 = smov %s786_s21 }
 0x127   : > { %s1025_s15 = smov %s774_s18  ;;  %25 = sbr.rel (!%p23_p1) target bundleno = 9 (0x9), region = 103 }
 0x12c   :  { %365 = vsyncpa [#allocation3], 1 }
 0x12d   :  { %367 = vsyncpa [#allocation3 + $0x1], 1 }
 0x12e   :  { %368 = vsyncpa [#allocation6], 1 }
 0x12f   :  { %370 = vsyncpa [#allocation6 + $0x1], 1 }
 0x130   :  { %371 = vsyncpa [#allocation4], 1 }
 0x131   :  { %373 = vsyncpa [#allocation4 + $0x1], 1 }
 0x132   :  { %374 = vsyncpa [#allocation9], 1 }
 0x133   :  { %376 = vsyncpa [#allocation9 + $0x1], 1 }

</bundles_post_ra>
